<compile_context>
chip_gen: v7x
topology: tpu7x:2x2x1
jax: 0.10.0
libtpu: 0.0.40
codegen_flags: <defaults>
</compile_context>

<pallas_src>
import math

import jax
import jax.numpy as jnp
from jax.experimental import pallas as pl
from jax.experimental.pallas import tpu as pltpu

D_K = 64                                   # module-level constant, as in the spec
_INV_SQRT_DK = 1.0 / math.sqrt(D_K)        # 0.125 — exactly representable


def _sdpa_kernel(q_ref, k_ref, v_ref, mask_ref, ctx_ref, attn_ref):
    # Block shapes:
    #   q    : (G, Tq, dk)      k : (G, Lk, dk)     v : (G, Lk, dv)
    #   mask : (G, Tq, Lk) int8
    #   ctx  : (G, Tq, dv)      attn : (G, Tq, Lk)
    #
    # Fold the 1/sqrt(d_k) scale into the (small) Q tile instead of the
    # (Tq, Lk) scores matrix.  Native dtype in, f32 accumulate on the MXU.
    q = q_ref[...] * _INV_SQRT_DK
    k = k_ref[...]
    v = v_ref[...]

    # scores = Q @ K^T / sqrt(d_k)   — contract last dims; no K^T materialized.
    scores = jnp.einsum(
        "gqd,gkd->gqk", q, k, preferred_element_type=jnp.float32
    )  # (G, Tq, Lk) f32

    # masked_fill_(attn_mask, -1e9)
    scores = jnp.where(mask_ref[...] != 0, jnp.float32(-1.0e9), scores)

    # Numerically-stable softmax over the key axis (matches nn.Softmax(dim=-1)).
    row_max = jnp.max(scores, axis=-1, keepdims=True)
    exps = jnp.exp(scores - row_max)
    denom = jnp.sum(exps, axis=-1, keepdims=True)
    # Reciprocal on the EUP (separate issue slot) + broadcast multiply on VPU.
    attn = exps * pl.reciprocal(denom, approx=True)     # (G, Tq, Lk) f32

    # context = attn @ V  — cast probabilities to V's dtype for the MXU.
    ctx = jnp.einsum(
        "gqk,gkd->gqd", attn.astype(v.dtype), v, preferred_element_type=jnp.float32
    )  # (G, Tq, dv) f32

    attn_ref[...] = attn.astype(attn_ref.dtype)
    ctx_ref[...] = ctx.astype(ctx_ref.dtype)


def _pick_q_tile(Lq):
    # Prefer MXU/lane-friendly tiles; fall back to the full (small/odd) Lq.
    if Lq <= 256:
        return Lq
    for cand in (256, 128, 64, 32):
        if Lq % cand == 0:
            return cand
    return Lq


def _pick_head_group(BH, tq, Lk, dk, dv, itemsize):
    # Per-head, per-step VMEM bytes (input + output blocks + f32 scores).
    per_head = (
        tq * dk * itemsize          # Q tile
        + Lk * dk * itemsize        # K (resident across q-tile axis)
        + Lk * dv * itemsize        # V
        + tq * Lk * 1               # int8 mask tile
        + tq * Lk * 4               # f32 scores / exp
        + tq * Lk * itemsize        # attn output tile
        + tq * dv * itemsize        # ctx output tile
    )
    # Keep <= ~24-28 MiB after the pipeline's double buffering — inside the
    # scoped-VMEM default and with comfortable headroom on v7x (64 MiB VMEM).
    budget = 12 * 1024 * 1024
    g = int(max(1, min(BH, budget // max(per_head, 1))))
    while BH % g != 0:              # G must evenly divide B * H
        g -= 1
    return g


def scaled_dot_product_attention(Q, K, V, attn_mask, *, q_tile=None, head_group=None):
    """Q:[B,H,Lq,dk] K:[B,H,Lk,dk] V:[B,H,Lk,dv] attn_mask:[B,H,Lq,Lk] (bool).

    Returns (context [B,H,Lq,dv], attn [B,H,Lq,Lk]) — same contract as the
    PyTorch module's forward (attn IS returned, so it must be written to HBM).
    """
    B, H, Lq, dk = Q.shape
    Lk = K.shape[2]
    dv = V.shape[3]
    BH = B * H

    q = Q.reshape(BH, Lq, dk)
    k = K.reshape(BH, Lk, dk)
    v = V.reshape(BH, Lk, dv)
    m = attn_mask.reshape(BH, Lq, Lk).astype(jnp.int8)   # 4x less HBM than int32

    tq = _pick_q_tile(Lq) if q_tile is None else q_tile
    G = (
        _pick_head_group(BH, tq, Lk, dk, dv, jnp.dtype(Q.dtype).itemsize)
        if head_group is None
        else head_group
    )

    grid = (BH // G, Lq // tq)   # (head-group axis, q-tile axis) — both parallel

    ctx, attn = pl.pallas_call(
        _sdpa_kernel,
        out_shape=(
            jax.ShapeDtypeStruct((BH, Lq, dv), Q.dtype),
            jax.ShapeDtypeStruct((BH, Lq, Lk), Q.dtype),
        ),
        grid=grid,
        in_specs=[
            pl.BlockSpec((G, tq, dk), lambda g, i: (g, i, 0)),
            pl.BlockSpec((G, Lk, dk), lambda g, i: (g, 0, 0)),   # K resident over i
            pl.BlockSpec((G, Lk, dv), lambda g, i: (g, 0, 0)),   # V resident over i
            pl.BlockSpec((G, tq, Lk), lambda g, i: (g, i, 0)),   # int8 mask tile
        ],
        out_specs=(
            # TODO(synk): dv=64 < 128 lanes -> partial stores on ctx; packing two
            # heads into a 128-wide last dim needs a wrapper transpose that costs
            # as much as it saves, so attn (last dim Lk) stays the layout anchor.
            pl.BlockSpec((G, tq, dv), lambda g, i: (g, i, 0)),
            pl.BlockSpec((G, tq, Lk), lambda g, i: (g, i, 0)),
        ),
        compiler_params=pltpu.CompilerParams(
            dimension_semantics=("parallel", "parallel"),
        ),
    )(q, k, v, m)

    return ctx.reshape(B, H, Lq, dv), attn.reshape(B, H, Lq, Lk)


def _reference(Q, K, V, attn_mask):
    scores = jnp.einsum("bhqd,bhkd->bhqk", Q, K) / math.sqrt(D_K)
    scores = jnp.where(attn_mask, -1.0e9, scores)
    attn = jax.nn.softmax(scores, axis=-1)
    ctx = jnp.einsum("bhqk,bhkd->bhqd", attn, V)
    return ctx, attn


if __name__ == "__main__":
    # Small shapes consistent with the module's forward contract.
    B, H, Lq, Lk, dk, dv = 2, 4, 8, 8, D_K, D_K

    key = jax.random.PRNGKey(0)
    kq, kk, kv, km = jax.random.split(key, 4)
    Q = jax.random.normal(kq, (B, H, Lq, dk), dtype=jnp.float32)
    K = jax.random.normal(kk, (B, H, Lk, dk), dtype=jnp.float32)
    V = jax.random.normal(kv, (B, H, Lk, dv), dtype=jnp.float32)
    attn_mask = jax.random.uniform(km, (B, H, Lq, Lk)) < 0.2  # boolean mask

    ctx, attn = scaled_dot_product_attention(Q, K, V, attn_mask)
    jax.block_until_ready((ctx, attn))

    ctx_ref, attn_ref = _reference(Q, K, V, attn_mask)
    # Tolerance accommodates the EUP approximate reciprocal in the softmax.
    assert jnp.allclose(ctx, ctx_ref, atol=2e-3, rtol=2e-3), "context mismatch"
    assert jnp.allclose(attn, attn_ref, atol=2e-3, rtol=2e-3), "attn mismatch"

    print("KERNEL_OK")
</pallas_src>

<mosaic_0001>
module attributes {stable_mosaic.version = 11 : i64} {
  func.func @_sdpa_kernel(%arg0: i32, %arg1: i32, %arg2: memref<8x8x64xf32, #tpu.memory_space<vmem>>, %arg3: memref<8x8x64xf32, #tpu.memory_space<vmem>>, %arg4: memref<8x8x64xf32, #tpu.memory_space<vmem>>, %arg5: memref<8x8x8xi8, #tpu.memory_space<vmem>>, %arg6: memref<8x8x64xf32, #tpu.memory_space<vmem>>, %arg7: memref<8x8x8xf32, #tpu.memory_space<vmem>>) attributes {dimension_semantics = [#tpu.dimension_semantics<parallel>, #tpu.dimension_semantics<parallel>], iteration_bounds = array<i64: 1, 1>, scalar_prefetch = 0 : i64, scratch_operands = 0 : i64, tpu.core_type = #tpu.core_type<tc>, window_params = [{transform_indices = @transform_0, window_bounds = array<i64: 8, 8, 64>}, {transform_indices = @transform_1, window_bounds = array<i64: 8, 8, 64>}, {transform_indices = @transform_2, window_bounds = array<i64: 8, 8, 64>}, {transform_indices = @transform_3, window_bounds = array<i64: 8, 8, 8>}, {transform_indices = @transform_4, window_bounds = array<i64: 8, 8, 64>}, {transform_indices = @transform_5, window_bounds = array<i64: 8, 8, 8>}]} {
    %c0 = arith.constant 0 : index
    %c0_0 = arith.constant 0 : index
    %c0_1 = arith.constant 0 : index
    %0 = vector.load %arg2[%c0, %c0_0, %c0_1] : memref<8x8x64xf32, #tpu.memory_space<vmem>>, vector<8x8x64xf32>
    %cst = arith.constant 1.250000e-01 : f32
    %1 = vector.broadcast %cst : f32 to vector<8x8x64xf32>
    %2 = arith.mulf %0, %1 : vector<8x8x64xf32>
    %c0_2 = arith.constant 0 : index
    %c0_3 = arith.constant 0 : index
    %c0_4 = arith.constant 0 : index
    %3 = vector.load %arg3[%c0_2, %c0_3, %c0_4] : memref<8x8x64xf32, #tpu.memory_space<vmem>>, vector<8x8x64xf32>
    %c0_5 = arith.constant 0 : index
    %c0_6 = arith.constant 0 : index
    %c0_7 = arith.constant 0 : index
    %4 = vector.load %arg4[%c0_5, %c0_6, %c0_7] : memref<8x8x64xf32, #tpu.memory_space<vmem>>, vector<8x8x64xf32>
    "tpu.trace_start"() <{level = 10 : i32, message = "gqd,gkd->gqk"}> : () -> ()
    %cst_8 = arith.constant dense<0.000000e+00> : vector<8x8x8xf32>
    %5 = tpu.matmul %2, %3, %cst_8 {dimension_numbers = #tpu.dot_dimension_numbers<[2], [2], [1], [1], [0, 0, 0, 1, 1, 1], [0], [0]>} : vector<8x8x64xf32>, vector<8x8x64xf32>, vector<8x8x8xf32> -> vector<8x8x8xf32>
    "tpu.trace_stop"() : () -> ()
    %c0_9 = arith.constant 0 : index
    %c0_10 = arith.constant 0 : index
    %c0_11 = arith.constant 0 : index
    %6 = vector.load %arg5[%c0_9, %c0_10, %c0_11] : memref<8x8x8xi8, #tpu.memory_space<vmem>>, vector<8x8x8xi8>
    %c0_i8 = arith.constant 0 : i8
    %7 = vector.broadcast %c0_i8 : i8 to vector<8x8x8xi8>
    %8 = arith.cmpi ne, %6, %7 : vector<8x8x8xi8>
    %cst_12 = arith.constant -1.000000e+09 : f32
    %9 = vector.broadcast %cst_12 : f32 to vector<8x8x8xf32>
    %10 = arith.select %8, %9, %5 : vector<8x8x8xi1>, vector<8x8x8xf32>
    %cst_13 = arith.constant dense<0xFF800000> : vector<8x8xf32>
    %11 = vector.multi_reduction <maximumf>, %10, %cst_13 [2] : vector<8x8x8xf32> to vector<8x8xf32>
    %12 = vector.shape_cast %11 : vector<8x8xf32> to vector<8x8x1xf32>
    %13 = vector.broadcast %12 : vector<8x8x1xf32> to vector<8x8x8xf32>
    %14 = arith.subf %10, %13 : vector<8x8x8xf32>
    %15 = math.exp %14 : vector<8x8x8xf32>
    %cst_14 = arith.constant dense<0.000000e+00> : vector<8x8xf32>
    %16 = vector.multi_reduction <add>, %15, %cst_14 [2] : vector<8x8x8xf32> to vector<8x8xf32>
    %17 = vector.shape_cast %16 : vector<8x8xf32> to vector<8x8x1xf32>
    %18 = tpu.reciprocal %17 {approx = true} : vector<8x8x1xf32> -> vector<8x8x1xf32>
    %19 = vector.broadcast %18 : vector<8x8x1xf32> to vector<8x8x8xf32>
    %20 = arith.mulf %15, %19 : vector<8x8x8xf32>
    "tpu.trace_start"() <{level = 10 : i32, message = "gqk,gkd->gqd"}> : () -> ()
    %cst_15 = arith.constant dense<0.000000e+00> : vector<8x8x64xf32>
    %21 = tpu.matmul %20, %4, %cst_15 {dimension_numbers = #tpu.dot_dimension_numbers<[2], [1], [1], [2], [0, 0, 0, 1, 1, 2], [0], [0]>} : vector<8x8x8xf32>, vector<8x8x64xf32>, vector<8x8x64xf32> -> vector<8x8x64xf32>
    "tpu.trace_stop"() : () -> ()
    %c0_16 = arith.constant 0 : index
    %c0_17 = arith.constant 0 : index
    %c0_18 = arith.constant 0 : index
    %22 = vector.load %arg7[%c0_16, %c0_17, %c0_18] : memref<8x8x8xf32, #tpu.memory_space<vmem>>, vector<8x8x8xf32>
    tpu.vector_store %arg7[%c0_16, %c0_17, %c0_18], %20 {strides = array<i32>} : memref<8x8x8xf32, #tpu.memory_space<vmem>>, vector<8x8x8xf32>,
    %c0_19 = arith.constant 0 : index
    %c0_20 = arith.constant 0 : index
    %c0_21 = arith.constant 0 : index
    %23 = vector.load %arg6[%c0_19, %c0_20, %c0_21] : memref<8x8x64xf32, #tpu.memory_space<vmem>>, vector<8x8x64xf32>
    tpu.vector_store %arg6[%c0_19, %c0_20, %c0_21], %21 {strides = array<i32>} : memref<8x8x64xf32, #tpu.memory_space<vmem>>, vector<8x8x64xf32>,
    return
  }
  func.func @transform_0(%arg0: i32, %arg1: i32) -> (i32, i32, i32) {
    %c0_i32 = arith.constant 0 : i32
    %c0_i32_0 = arith.constant 0 : i32
    return %arg0, %arg1, %c0_i32 : i32, i32, i32
  }
  func.func @transform_1(%arg0: i32, %arg1: i32) -> (i32, i32, i32) {
    %c0_i32 = arith.constant 0 : i32
    %c0_i32_0 = arith.constant 0 : i32
    %c0_i32_1 = arith.constant 0 : i32
    return %arg0, %c0_i32, %c0_i32_0 : i32, i32, i32
  }
  func.func @transform_2(%arg0: i32, %arg1: i32) -> (i32, i32, i32) {
    %c0_i32 = arith.constant 0 : i32
    %c0_i32_0 = arith.constant 0 : i32
    %c0_i32_1 = arith.constant 0 : i32
    return %arg0, %c0_i32, %c0_i32_0 : i32, i32, i32
  }
  func.func @transform_3(%arg0: i32, %arg1: i32) -> (i32, i32, i32) {
    %c0_i32 = arith.constant 0 : i32
    %c0_i32_0 = arith.constant 0 : i32
    return %arg0, %arg1, %c0_i32 : i32, i32, i32
  }
  func.func @transform_4(%arg0: i32, %arg1: i32) -> (i32, i32, i32) {
    %c0_i32 = arith.constant 0 : i32
    %c0_i32_0 = arith.constant 0 : i32
    return %arg0, %arg1, %c0_i32 : i32, i32, i32
  }
  func.func @transform_5(%arg0: i32, %arg1: i32) -> (i32, i32, i32) {
    %c0_i32 = arith.constant 0 : i32
    %c0_i32_0 = arith.constant 0 : i32
    return %arg0, %arg1, %c0_i32 : i32, i32, i32
  }
}

</mosaic_0001>

<bundles_post_ra>
// kernel: tpu_custom_call.1
= control target key start
LH: loop header
LB: loop body
LE: loop exit
PB: predicated region body
PF: predicated region fallthrough
CT: control target
= control target key end

     0   :  { %11 = vsyncpa [#allocation3], 0  ;;  %s2074_s0 = inlined_call_operand.hbm [shape: f32[8,8,64], index: 0, kind: input, shape index: {}]   ;;  %s2075_s1 = inlined_call_operand.hbm [shape: f32[8,8,64], index: 1, kind: input, shape index: {}]   ;;  %s2076_s2 = inlined_call_operand.hbm [shape: f32[8,8,64], index: 2, kind: input, shape index: {}]   ;;  %s2077_s3 = inlined_call_operand.hbm [shape: s8[8,8,8], index: 3, kind: input, shape index: {}]   ;;  %s2078_s4 = inlined_call_operand.hbm [shape: f32[8,8,64], index: 4, kind: output, shape index: {0}]   ;;  %s2079_s5 = inlined_call_operand.hbm [shape: f32[8,8,8], index: 5, kind: output, shape index: {1}]  }
   0x1   :  { %12 = vsyncpa [#allocation6], 0 }
   0x2   :  { %13 = vsyncpa [#allocation9], 0 }
   0x3   :  { %14 = vsyncpa [#allocation4], 0 }
   0x4   :  { %15 = vsyncpa [#allocation12], 0  ;;  %s1814_s18 = smov [#allocation5]   ;;  %s1815_s20 = smov [#allocation2]  }
   0x5   :  { %s33_s19 = sshll.u32 %s1814_s18, 4  ;;  %s21_s21 = sshll.u32 %s1815_s20, 4  ;;  %s34_s19 = int_to_ptr.vmem [resolvable:$true] %s33_s19  ;;  %s1857_s21 = int_to_ptr.vmem [resolvable:$true] %s21_s21 }
   0x6   :  { %s1672_s24 = scalar_lea.hbm %s2075_s1, 1024 }
   0x7   :  { %p1673_p0 = scmp.ne.s32.totalorder %s2075_s1, %s1672_s24  ;;  %p1676_p1 = scmp.lt.u32.totalorder %s1672_s24, %s2075_s1 }
   0x9   :  { %p1678_p2 = pnand %p1676_p1, %p1673_p0 }
   0xb   :  { %1681 = shalt.err (!%p1678_p2)
}
   0xc   :  { %s1682_s29 = scalar_lea.vmem %s34_s19, 1024  ;;  %p1687_p4 = scmp.lt.s32.totalorder %s34_s19, %s34_s19 }
   0xd   :  { %p1683_p3 = scmp.ne.s32.totalorder %s34_s19, %s1682_s29  ;;  %p1688_p5 = scmp.lt.s32.totalorder %s1682_s29, %s1682_s29 }
   0xf   :  { %p1689_p6 = por %p1688_p5, %p1687_p4 }
  0x11   :  { %p1690_p7 = pnand %p1689_p6, %p1683_p3 }
  0x13   :  { %1693 = shalt.err (!%p1690_p7)
}
  0x14   :  { %s1816_s30 = smov 128   ;;  %s1817_s6 = smov 8  }
  0x15   :  { %39 = dma.hbm_to_vmem [thread:$0]  %s2075_s1, 1024, %s34_s19, [#allocation6], %s1816_s30, %s1816_s30, %s1817_s6  }
  0x16   :  { %s1694_s11 = scalar_lea.hbm %s2074_s0, 1024 }
  0x17   :  { %p1695_p8 = scmp.ne.s32.totalorder %s2074_s0, %s1694_s11  ;;  %p1698_p9 = scmp.lt.u32.totalorder %s1694_s11, %s2074_s0 }
  0x19   :  { %p1700_p10 = pnand %p1698_p9, %p1695_p8 }
  0x1b   :  { %1703 = shalt.err (!%p1700_p10)
}
  0x1c   :  { %s1704_s16 = scalar_lea.vmem %s1857_s21, 1024  ;;  %p1709_p12 = scmp.lt.s32.totalorder %s1857_s21, %s1857_s21 }
  0x1d   :  { %p1705_p11 = scmp.ne.s32.totalorder %s1857_s21, %s1704_s16  ;;  %p1710_p13 = scmp.lt.s32.totalorder %s1704_s16, %s1704_s16 }
  0x1f   :  { %p1711_p0 = por %p1710_p13, %p1709_p12 }
  0x21   :  { %p1712_p1 = pnand %p1711_p0, %p1705_p11 }
  0x23   :  { %1715 = shalt.err (!%p1712_p1)
}
  0x24   :  { %27 = dma.hbm_to_vmem [thread:$0]  %s2074_s0, 1024, %s1857_s21, [#allocation3], %s1816_s30, %s1816_s30, %s1817_s6  }
  0x25   :  { %s1818_s18 = smov [#allocation7]   ;;  %s1819_s20 = smov [#allocation8]  }
  0x26   :  { %s45_s19 = sshll.u32 %s1818_s18, 4  ;;  %s57_s22 = sshll.u32 %s1819_s20, 4  ;;  %s46_s19 = int_to_ptr.vmem [resolvable:$true] %s45_s19  ;;  %s1894_s22 = int_to_ptr.vmem [resolvable:$true] %s57_s22 }
  0x27   :  { %s1716_s25 = scalar_lea.hbm %s2076_s2, 1024 }
  0x28   :  { %p1717_p2 = scmp.ne.s32.totalorder %s2076_s2, %s1716_s25  ;;  %p1720_p3 = scmp.lt.u32.totalorder %s1716_s25, %s2076_s2 }
  0x2a   :  { %p1722_p4 = pnand %p1720_p3, %p1717_p2 }
  0x2c   :  { %1725 = shalt.err (!%p1722_p4)
}
  0x2d   :  { %s1726_s0 = scalar_lea.vmem %s46_s19, 1024  ;;  %p1731_p6 = scmp.lt.s32.totalorder %s46_s19, %s46_s19 }
  0x2e   :  { %p1727_p5 = scmp.ne.s32.totalorder %s46_s19, %s1726_s0  ;;  %p1732_p7 = scmp.lt.s32.totalorder %s1726_s0, %s1726_s0 }
  0x30   :  { %p1733_p8 = por %p1732_p7, %p1731_p6 }
  0x32   :  { %p1734_p9 = pnand %p1733_p8, %p1727_p5 }
  0x34   :  { %1737 = shalt.err (!%p1734_p9)
}
  0x35   :  { %51 = dma.hbm_to_vmem [thread:$0]  %s2076_s2, 1024, %s46_s19, [#allocation6], %s1816_s30, %s1816_s30, %s1817_s6  }
  0x36   :  { %s1738_s10 = scalar_lea.hbm %s2077_s3, 256 }
  0x37   :  { %p1739_p10 = scmp.ne.s32.totalorder %s2077_s3, %s1738_s10  ;;  %p1742_p11 = scmp.lt.u32.totalorder %s1738_s10, %s2077_s3 }
  0x39   :  { %p1744_p12 = pnand %p1742_p11, %p1739_p10 }
  0x3b   :  { %1747 = shalt.err (!%p1744_p12)
}
  0x3c   :  { %s1748_s15 = scalar_lea.vmem %s1894_s22, 256  ;;  %p1753_p0 = scmp.lt.s32.totalorder %s1894_s22, %s1894_s22 }
  0x3d   :  { %p1749_p13 = scmp.ne.s32.totalorder %s1894_s22, %s1748_s15  ;;  %p1754_p1 = scmp.lt.s32.totalorder %s1748_s15, %s1748_s15 }
  0x3f   :  { %p1755_p2 = por %p1754_p1, %p1753_p0 }
  0x41   :  { %p1756_p3 = pnand %p1755_p2, %p1749_p13 }
  0x43   :  { %1759 = shalt.err (!%p1756_p3)
}
  0x44   :  { %s1820_s2 = smov 32   ;;  %s1821_s16 = smov 2  }
  0x45   :  { %63 = dma.hbm_to_vmem [thread:$0]  %s2077_s3, 256, %s1894_s22, [#allocation9], %s1820_s2, %s1820_s2, %s1821_s16  }
  0x46   :  { %1804 = dma.done.wait [#allocation3], 1024  }
  0x47   :  { %1805 = vsyncadd [#allocation3], 4294966272 }
  0x48   :  { %1806 = dma.done.wait [#allocation6], 2048  }
  0x49   :  { %1807 = vsyncadd [#allocation6], 4294965248 }
  0x4a   :  { %1808 = dma.done.wait [#allocation9], 256  }
  0x4b   :  { %1809 = vsyncadd [#allocation9], 4294967040  ;;  %v1822_v0 = vmov 0.0   ;;  %vm1823_vm0 = vmmov 0   ;;  %vm110_vm1 = vcmask 523264   ;;  %v94_v1 = vld [vmem:[#allocation5] sm:$0xff] }
  0x4c   :  { %1547 = vmatprep.subr.mxu0 %v1822_v0  ;;  %1549 = vmatprep.mubr.msk.f32.mxu0 %vm1823_vm0, %v1822_v0  ;;  %v78_v2 = vld [vmem:[#allocation2] sm:$0xff]  ;;  %v95_v3 = vld [vmem:[#allocation5 + $0x8] sm:$0xff]  ;;  %v80_v6 = vld [vmem:[#allocation2 + $0x10] sm:$0xff]  ;;  %v1824_v28 = vmov 0   ;;  %vm767_vm10 = vcmask 64512   ;;  %s1825_s3 = smov [#allocation11]  }
  0x4d   :  { %1552 = vmatprep.subr.mxu1 %v1822_v0  ;;  %1554 = vmatprep.mubr.msk.f32.mxu1 %vm1823_vm0, %v1822_v0  ;;  %v86_v4 = vmul.f32 0.125, %v78_v2  ;;  %v79_v5 = vld [vmem:[#allocation2 + $0x8] sm:$0xff]  ;;  %v96_v7 = vld [vmem:[#allocation5 + $0x10] sm:$0xff]  ;;  %v97_v9 = vld [vmem:[#allocation5 + $0x18] sm:$0xff]  ;;  %v88_v11 = vmul.f32 0.125, %v80_v6  ;;  %s1473_s18 = sshll.u32 %s1825_s3, 4  ;;  %s1474_s18 = int_to_ptr.vmem [resolvable:$true] %s1473_s18 }
  0x4e   :  { %1548 = vmatpush3.xpose.msk.msra.mxu0 %vm110_vm1, %v94_v1  ;;  %1553 = vmatpush3.xpose.msk.msra.mxu1 %vm110_vm1, %v95_v3  ;;  %v87_v8 = vmul.f32 0.125, %v79_v5  ;;  %v81_v10 = vld [vmem:[#allocation2 + $0x18] sm:$0xff]  ;;  %v82_v12 = vld [vmem:[#allocation2 + $0x20] sm:$0xff]  ;;  %v83_v15 = vld [vmem:[#allocation2 + $0x28] sm:$0xff]  ;;  %s1760_s19 = scalar_lea.vmem %s1474_s18, 1024  ;;  %p1765_p5 = scmp.lt.s32.totalorder %s1474_s18, %s1474_s18 }
  0x4f   :  { %1557 = vmatprep.subr.mxu0 %v1822_v0  ;;  %1562 = vmatprep.subr.mxu1 %v1822_v0  ;;  %v98_v13 = vld [vmem:[#allocation5 + $0x20] sm:$0xff]  ;;  %v89_v14 = vmul.f32 0.125, %v81_v10  ;;  %v90_v16 = vmul.f32 0.125, %v82_v12  ;;  %v99_v17 = vld [vmem:[#allocation5 + $0x28] sm:$0xff]  ;;  %v84_v18 = vld [vmem:[#allocation2 + $0x30] sm:$0xff]  ;;  %v91_v20 = vmul.f32 0.125, %v83_v15  ;;  %p1761_p4 = scmp.ne.s32.totalorder %s1474_s18, %s1760_s19  ;;  %p1766_p6 = scmp.lt.s32.totalorder %s1760_s19, %s1760_s19 }
  0x50   :  { %v100_v19 = vld [vmem:[#allocation5 + $0x30] sm:$0xff]  ;;  %v85_v21 = vld [vmem:[#allocation2 + $0x38] sm:$0xff]  ;;  %v92_v22 = vmul.f32 0.125, %v84_v18  ;;  %v719_v25 = vld [vmem:[#allocation8] sm:$0x3] }
  0x51   :  { %1550 = vmatmul.mubr.msk.f32.vlgmr.msra.gmra.mrb[0].mxu0 %vm110_vm1, %v86_v4  ;;  %1555 = vmatmul.mubr.msk.f32.vlgmr.msra.gmra.mrb[0].mxu1 %vm110_vm1, %v87_v8  ;;  %v101_v23 = vld [vmem:[#allocation5 + $0x38] sm:$0xff]  ;;  %v93_v24 = vmul.f32 0.125, %v85_v21  ;;  %v720_v26 = vld [vmem:[#allocation8 + $0x2] sm:$0x3]  ;;  %vm727_vm2 = vnez %v719_v25  ;;  %v721_v27 = vld [vmem:[#allocation8 + $0x4] sm:$0x3]  ;;  %p1767_p7 = por %p1766_p6, %p1765_p5 }
  0x52   :  { %1558 = vmatpush3.xpose.msk.msra.mxu0 %vm110_vm1, %v96_v7  ;;  %1559 = vmatprep.mubr.msk.f32.mxu0 %vm1823_vm0, %v1822_v0  ;;  %vm728_vm3 = vnez %v720_v26  ;;  %v735_v29 = vsel %vm727_vm2, 16843009, %v1824_v28  ;;  %v722_v31 = vld [vmem:[#allocation8 + $0x6] sm:$0x3]  ;;  %vm729_vm4 = vnez %v721_v27  ;;  %v723_v32 = vld [vmem:[#allocation8 + $0x8] sm:$0x3] }
  0x53   :  { %1567 = vmatprep.subr.mxu0 %v1822_v0  ;;  %1563 = vmatpush3.xpose.msk.msra.mxu1 %vm110_vm1, %v97_v9  ;;  %v736_v30 = vsel %vm728_vm3, 16843009, %v1824_v28  ;;  %v743_v33 = vunpack.c.0.s8 %v735_v29  ;;  %vm730_vm5 = vnez %v722_v31  ;;  %v724_v35 = vld [vmem:[#allocation8 + $0xa] sm:$0x3]  ;;  %v737_v36 = vsel %vm729_vm4, 16843009, %v1824_v28  ;;  %p1768_p8 = pnand %p1767_p7, %p1761_p4 }
  0x54   :  { %1564 = vmatprep.mubr.msk.f32.mxu1 %vm1823_vm0, %v1822_v0  ;;  %1572 = vmatprep.subr.mxu1 %v1822_v0  ;;  %v744_v34 = vunpack.c.0.s8 %v736_v30  ;;  %vm731_vm6 = vnez %v723_v32  ;;  %v738_v37 = vsel %vm730_vm5, 16843009, %v1824_v28  ;;  %vm732_vm7 = vnez %v724_v35  ;;  %v725_v38 = vld [vmem:[#allocation8 + $0xc] sm:$0x3]  ;;  %v726_v41 = vld [vmem:[#allocation8 + $0xe] sm:$0x3] }
  0x55   :  { %1560 = vmatmul.mubr.msk.f32.vlgmr.msra.gmra.mrb[2].mxu0 %vm110_vm1, %v88_v11  ;;  %vm751_vm8 = vcmp.ne.s32.totalorder %v743_v33, 0  ;;  %v745_v39 = vunpack.c.0.s8 %v737_v36  ;;  %v739_v40 = vsel %vm731_vm6, 16843009, %v1824_v28  ;;  %v746_v44 = vunpack.c.0.s8 %v738_v37 }
  0x56   :  { %1568 = vmatpush3.xpose.msk.msra.mxu0 %vm110_vm1, %v98_v13  ;;  %1569 = vmatprep.mubr.msk.f32.mxu0 %vm1823_vm0, %v1822_v0  ;;  %vm752_vm9 = vcmp.ne.s32.totalorder %v744_v34, 0  ;;  %v740_v45 = vsel %vm732_vm7, 16843009, %v1824_v28  ;;  %vm733_vm11 = vnez %v725_v38  ;;  %v747_v51 = vunpack.c.0.s8 %v739_v40 }
  0x57   :  { %1565 = vmatmul.mubr.msk.f32.vlgmr.msra.gmra.mrb[2].mxu1 %vm110_vm1, %v89_v14  ;;  %1577 = vmatprep.subr.mxu0 %v1822_v0  ;;  %vm753_vm12 = vcmp.ne.s32.totalorder %v745_v39, 0  ;;  %vm734_vm13 = vnez %v726_v41  ;;  %v741_v52 = vsel %vm733_vm11, 16843009, %v1824_v28  ;;  %vm754_vm14 = vcmp.ne.s32.totalorder %v746_v44, 0 }
  0x58   :  { %1573 = vmatpush3.xpose.msk.msra.mxu1 %vm110_vm1, %v99_v17  ;;  %1574 = vmatprep.mubr.msk.f32.mxu1 %vm1823_vm0, %v1822_v0  ;;  %v748_v55 = vunpack.c.0.s8 %v740_v45  ;;  %v742_v58 = vsel %vm734_vm13, 16843009, %v1824_v28  ;;  %vm755_vm15 = vcmp.ne.s32.totalorder %v747_v51, 0  ;;  %v749_v61 = vunpack.c.0.s8 %v741_v52 }
  0x59   :  { %1570 = vmatmul.mubr.msk.f32.vlgmr.msra.gmra.mrb[4].mxu0 %vm110_vm1, %v90_v16  ;;  %1582 = vmatprep.subr.mxu1 %v1822_v0  ;;  %v750_v3 = vunpack.c.0.s8 %v742_v58 }
  0x5a   :  { %1578 = vmatpush3.xpose.msk.msra.mxu0 %vm110_vm1, %v100_v19  ;;  %1579 = vmatprep.mubr.msk.f32.mxu0 %vm1823_vm0, %v1822_v0  ;;  %vm756_vm2 = vcmp.ne.s32.totalorder %v748_v55, 0  ;;  %vm757_vm3 = vcmp.ne.s32.totalorder %v749_v61, 0 }
  0x5b   :  { %1575 = vmatmul.mubr.msk.f32.vlgmr.msra.gmra.mrb[4].mxu1 %vm110_vm1, %v91_v20  ;;  %1587 = vmatprep.subr.mxu0 %v1822_v0  ;;  %vm758_vm4 = vcmp.ne.s32.totalorder %v750_v3, 0 }
  0x5c   :  { %1583 = vmatpush3.xpose.msk.msra.mxu1 %vm110_vm1, %v101_v23  ;;  %1584 = vmatprep.mubr.msk.f32.mxu1 %vm1823_vm0, %v1822_v0 }
  0x5d   :  { %1580 = vmatmul.mubr.msk.f32.vlgmr.msra.gmra.mrb[6].mxu0 %vm110_vm1, %v92_v22  ;;  %1592 = vmatprep.subr.mxu1 %v1822_v0 }
  0x5e   :  { %1589 = vmatprep.mubr.msk.f32.mxu0 %vm1823_vm0, %v1822_v0 }
  0x5f   :  { %1585 = vmatmul.mubr.msk.f32.vlgmr.msra.gmra.mrb[6].mxu1 %vm110_vm1, %v93_v24 }
  0x60   :  { %1594 = vmatprep.mubr.msk.f32.mxu1 %vm1823_vm0, %v1822_v0 }
 0x124   :  { %v183_v42 = vpop.f32.mrb[0].mxu0  ;;  %v259_v43 = vpop.f32.mrb[0].mxu1 }
 0x125   :  { %v759_v46 = vsel %vm751_vm8, -1e+09, %v183_v42  ;;  %v1551_v47 = vpop.f32.mrb[1].mxu0  ;;  %v760_v48 = vsel %vm752_vm9, -1e+09, %v259_v43  ;;  %v1556_v49 = vpop.f32.mrb[1].mxu1 }
 0x126   :  { %v768_v50 = vsel %vm767_vm10, %v759_v46, -inf  ;;  %v771_v54 = vsel %vm767_vm10, %v760_v48, -inf }
 0x127   :  { %769 = vmax.xlane.f32.xlu0 %v768_v50 }
 0x128   :  { %v335_v53 = vpop.f32.mrb[2].mxu0 }
 0x129   :  { %v761_v56 = vsel %vm753_vm12, -1e+09, %v335_v53  ;;  %v1561_v57 = vpop.f32.mrb[3].mxu0 }
 0x12a   :  { %v774_v59 = vsel %vm767_vm10, %v761_v56, -inf  ;;  %v411_v60 = vpop.f32.mrb[2].mxu1 }
 0x12b   :  { %772 = vmax.xlane.f32.xlu0 %v771_v54  ;;  %775 = vmax.xlane.f32.xlu1 %v774_v59  ;;  %v762_v62 = vsel %vm754_vm14, -1e+09, %v411_v60  ;;  %v1566_v63 = vpop.f32.mrb[3].mxu1  ;;  %v102_v59 = vld [vmem:[#allocation7] sm:$0xff]  ;;  %v103_v60 = vld [vmem:[#allocation7 + $0x8] sm:$0xff] }
 0x12c   :  { %v487_v1 = vpop.f32.mrb[4].mxu0  ;;  %v777_v2 = vsel %vm767_vm10, %v762_v62, -inf  ;;  %1588 = vmatpush3.msra.mxu0 %v102_v59  ;;  %1593 = vmatpush3.msra.mxu1 %v103_v60 }
 0x12d   :  { %v763_v4 = vsel %vm755_vm15, -1e+09, %v487_v1  ;;  %v1571_v5 = vpop.f32.mrb[5].mxu0  ;;  %1597 = vmatprep.subr.mxu0 %v1822_v0  ;;  %1602 = vmatprep.subr.mxu1 %v1822_v0 }
 0x12e   :  { %v780_v6 = vsel %vm767_vm10, %v763_v4, -inf  ;;  %v563_v7 = vpop.f32.mrb[4].mxu1 }
 0x12f   :  { %778 = vmax.xlane.f32.xlu1 %v777_v2  ;;  %781 = vmax.xlane.f32.xlu0 %v780_v6  ;;  %v764_v8 = vsel %vm756_vm2, -1e+09, %v563_v7  ;;  %v1576_v9 = vpop.f32.mrb[5].mxu1  ;;  %v104_v6 = vld [vmem:[#allocation7 + $0x10] sm:$0xff] }
 0x130   :  { %v639_v10 = vpop.f32.mrb[6].mxu0  ;;  %v783_v11 = vsel %vm767_vm10, %v764_v8, -inf }
 0x131   :  { %v765_v12 = vsel %vm757_vm3, -1e+09, %v639_v10  ;;  %v1581_v13 = vpop.f32.mrb[7].mxu0 }
 0x132   :  { %v786_v14 = vsel %vm767_vm10, %v765_v12, -inf  ;;  %v715_v15 = vpop.f32.mrb[6].mxu1 }
 0x133   :  { %784 = vmax.xlane.f32.xlu1 %v783_v11  ;;  %787 = vmax.xlane.f32.xlu0 %v786_v14  ;;  %v766_v16 = vsel %vm758_vm4, -1e+09, %v715_v15  ;;  %v1586_v17 = vpop.f32.mrb[7].mxu1  ;;  %v106_v14 = vld [vmem:[#allocation7 + $0x20] sm:$0xff] }
 0x134   :  { %v789_v18 = vsel %vm767_vm10, %v766_v16, -inf }
 0x137   :  { %790 = vmax.xlane.f32.xlu1 %v789_v18  ;;  %v107_v18 = vld [vmem:[#allocation7 + $0x28] sm:$0xff] }
 0x1b4   :  { %v770_v19 = vpop.xlane.xlu0 %769 }
 0x1b5   :  { %v792_v20 = vsub.f32 %v759_v46, %v770_v19 }
 0x1b7   :  { %v800_v21 = vmul.f32 1.442695, %v792_v20  ;;  %v108_v20 = vld [vmem:[#allocation7 + $0x30] sm:$0xff] }
 0x1b8   :  { %v773_v22 = vpop.xlane.xlu0 %772  ;;  %v776_v23 = vpop.xlane.xlu1 %775 }
 0x1b9   :  { %1640 = vpow2.f32 %v800_v21  ;;  %v793_v24 = vsub.f32 %v760_v48, %v773_v22  ;;  %v794_v25 = vsub.f32 %v761_v56, %v776_v23 }
 0x1bb   :  { %v802_v26 = vmul.f32 1.442695, %v793_v24  ;;  %v804_v27 = vmul.f32 1.442695, %v794_v25  ;;  %v109_v24 = vld [vmem:[#allocation7 + $0x38] sm:$0xff] }
 0x1bc   :  { %v779_v28 = vpop.xlane.xlu1 %778  ;;  %v782_v29 = vpop.xlane.xlu0 %781 }
 0x1bd   :  { %1642 = vpow2.f32 %v802_v26  ;;  %v795_v30 = vsub.f32 %v762_v62, %v779_v28  ;;  %v796_v31 = vsub.f32 %v763_v4, %v782_v29 }
 0x1be   :  { %1644 = vpow2.f32 %v804_v27 }
 0x1bf   :  { %v806_v32 = vmul.f32 1.442695, %v795_v30  ;;  %v808_v33 = vmul.f32 1.442695, %v796_v31 }
 0x1c0   :  { %v785_v34 = vpop.xlane.xlu1 %784  ;;  %v788_v35 = vpop.xlane.xlu0 %787 }
 0x1c1   :  { %1646 = vpow2.f32 %v806_v32  ;;  %v797_v36 = vsub.f32 %v764_v8, %v785_v34  ;;  %v798_v37 = vsub.f32 %v765_v12, %v788_v35  ;;  %v105_v12 = vld [vmem:[#allocation7 + $0x18] sm:$0xff] }
 0x1c2   :  { %1648 = vpow2.f32 %v808_v33 }
 0x1c3   :  { %v1641_v38 = vpop.eup %1640  ;;  %v810_v39 = vmul.f32 1.442695, %v797_v36  ;;  %v812_v40 = vmul.f32 1.442695, %v798_v37 }
 0x1c4   :  { %v791_v41 = vpop.xlane.xlu1 %790  ;;  %v816_v42 = vsel %vm767_vm10, %v1641_v38, 0.0 }
 0x1c5   :  { %1650 = vpow2.f32 %v810_v39  ;;  %v799_v43 = vsub.f32 %v766_v16, %v791_v41  ;;  %817 = vadd.xlane.f32.xlu0 %v816_v42 }
 0x1c6   :  { %1652 = vpow2.f32 %v812_v40 }
 0x1c7   :  { %v1643_v44 = vpop.eup %1642  ;;  %v814_v45 = vmul.f32 1.442695, %v799_v43 }
 0x1c8   :  { %v1645_v46 = vpop.eup %1644  ;;  %v819_v47 = vsel %vm767_vm10, %v1643_v44, 0.0 }
 0x1c9   :  { %1654 = vpow2.f32 %v814_v45  ;;  %820 = vadd.xlane.f32.xlu1 %v819_v47  ;;  %v822_v48 = vsel %vm767_vm10, %v1645_v46, 0.0 }
 0x1ca   :  { %823 = vadd.xlane.f32.xlu0 %v822_v48 }
 0x1cb   :  { %v1647_v49 = vpop.eup %1646 }
 0x1cc   :  { %v1649_v50 = vpop.eup %1648  ;;  %v825_v51 = vsel %vm767_vm10, %v1647_v49, 0.0 }
 0x1cd   :  { %826 = vadd.xlane.f32.xlu1 %v825_v51  ;;  %v828_v52 = vsel %vm767_vm10, %v1649_v50, 0.0 }
 0x1ce   :  { %829 = vadd.xlane.f32.xlu0 %v828_v52 }
 0x1cf   :  { %v1987_v53 = vpop.eup %1650 }
 0x1d0   :  { %v1989_v54 = vpop.eup %1652  ;;  %v831_v55 = vsel %vm767_vm10, %v1987_v53, 0.0 }
 0x1d1   :  { %832 = vadd.xlane.f32.xlu1 %v831_v55  ;;  %v834_v56 = vsel %vm767_vm10, %v1989_v54, 0.0 }
 0x1d2   :  { %835 = vadd.xlane.f32.xlu0 %v834_v56 }
 0x1d3   :  { %v1995_v57 = vpop.eup %1654 }
 0x1d4   :  { %v837_v58 = vsel %vm767_vm10, %v1995_v57, 0.0 }
 0x1d5   :  { %838 = vadd.xlane.f32.xlu1 %v837_v58 }
 0x252   :  { %v818_v61 = vpop.xlane.xlu0 %817 }
 0x253   :  { %1656 = vrcp.f32 %v818_v61 }
 0x256   :  { %v821_v62 = vpop.xlane.xlu1 %820 }
 0x257   :  { %1658 = vrcp.f32 %v821_v62  ;;  %v824_v63 = vpop.xlane.xlu0 %823 }
 0x258   :  { %1660 = vrcp.f32 %v824_v63 }
 0x25a   :  { %v827_v1 = vpop.xlane.xlu1 %826 }
 0x25b   :  { %1662 = vrcp.f32 %v827_v1  ;;  %v830_v2 = vpop.xlane.xlu0 %829 }
 0x25c   :  { %1664 = vrcp.f32 %v830_v2 }
 0x25d   :  { %v1657_v3 = vpop.eup %1656 }
 0x25e   :  { %v848_v4 = vmul.f32 %v1657_v3, %v1641_v38  ;;  %v833_v5 = vpop.xlane.xlu1 %832 }
 0x25f   :  { %1666 = vrcp.f32 %v833_v5  ;;  %v836_v7 = vpop.xlane.xlu0 %835 }
 0x260   :  { %1440 = vst.msk [vmem:[#allocation11] sm:$0xff] %vm767_vm10, %v848_v4  ;;  %1668 = vrcp.f32 %v836_v7  ;;  %1590 = vmatmul.mubr.msk.f32.vlgmr.msra.gmra.mrb[8].mxu0 %vm767_vm10, %v848_v4 }
 0x261   :  { %v1659_v8 = vpop.eup %1658  ;;  %1598 = vmatpush3.msra.mxu0 %v104_v6  ;;  %1599 = vmatprep.mubr.msk.f32.mxu0 %vm1823_vm0, %v1822_v0 }
 0x262   :  { %v1661_v9 = vpop.eup %1660  ;;  %v849_v10 = vmul.f32 %v1659_v8, %v1643_v44  ;;  %v839_v11 = vpop.xlane.xlu1 %838  ;;  %1607 = vmatprep.subr.mxu0 %v1822_v0 }
 0x263   :  { %v850_v13 = vmul.f32 %v1661_v9, %v1645_v46  ;;  %1670 = vrcp.f32 %v839_v11 }
 0x264   :  { %1441 = vst.msk [vmem:[#allocation11 + $0x8] sm:$0xff] %vm767_vm10, %v849_v10  ;;  %1595 = vmatmul.mubr.msk.f32.vlgmr.msra.gmra.mrb[8].mxu1 %vm767_vm10, %v849_v10 }
 0x265   :  { %v1663_v15 = vpop.eup %1662  ;;  %1442 = vst.msk [vmem:[#allocation11 + $0x10] sm:$0xff] %vm767_vm10, %v850_v13  ;;  %1600 = vmatmul.mubr.msk.f32.vlgmr.msra.gmra.mrb[10].mxu0 %vm767_vm10, %v850_v13  ;;  %1603 = vmatpush3.msra.mxu1 %v105_v12 }
 0x266   :  { %v1665_v16 = vpop.eup %1664  ;;  %v851_v17 = vmul.f32 %v1663_v15, %v1647_v49  ;;  %1604 = vmatprep.mubr.msk.f32.mxu1 %vm1823_vm0, %v1822_v0  ;;  %1608 = vmatpush3.msra.mxu0 %v106_v14 }
 0x267   :  { %v852_v19 = vmul.f32 %v1665_v16, %v1649_v50  ;;  %1609 = vmatprep.mubr.msk.f32.mxu0 %vm1823_vm0, %v1822_v0  ;;  %1612 = vmatprep.subr.mxu1 %v1822_v0 }
 0x268   :  { %1443 = vst.msk [vmem:[#allocation11 + $0x18] sm:$0xff] %vm767_vm10, %v851_v17  ;;  %1605 = vmatmul.mubr.msk.f32.vlgmr.msra.gmra.mrb[10].mxu1 %vm767_vm10, %v851_v17  ;;  %1617 = vmatprep.subr.mxu0 %v1822_v0 }
 0x269   :  { %v1667_v21 = vpop.eup %1666  ;;  %1444 = vst.msk [vmem:[#allocation11 + $0x20] sm:$0xff] %vm767_vm10, %v852_v19  ;;  %1610 = vmatmul.mubr.msk.f32.vlgmr.msra.gmra.mrb[12].mxu0 %vm767_vm10, %v852_v19  ;;  %1613 = vmatpush3.msra.mxu1 %v107_v18 }
 0x26a   :  { %v1669_v22 = vpop.eup %1668  ;;  %v853_v23 = vmul.f32 %v1667_v21, %v1987_v53  ;;  %1614 = vmatprep.mubr.msk.f32.mxu1 %vm1823_vm0, %v1822_v0  ;;  %1618 = vmatpush3.msra.mxu0 %v108_v20 }
 0x26b   :  { %v854_v25 = vmul.f32 %v1669_v22, %v1989_v54  ;;  %1619 = vmatprep.mubr.msk.f32.mxu0 %vm1823_vm0, %v1822_v0  ;;  %1622 = vmatprep.subr.mxu1 %v1822_v0 }
 0x26c   :  { %1445 = vst.msk [vmem:[#allocation11 + $0x28] sm:$0xff] %vm767_vm10, %v853_v23  ;;  %1615 = vmatmul.mubr.msk.f32.vlgmr.msra.gmra.mrb[12].mxu1 %vm767_vm10, %v853_v23 }
 0x26d   :  { %v1671_v26 = vpop.eup %1670  ;;  %1446 = vst.msk [vmem:[#allocation11 + $0x30] sm:$0xff] %vm767_vm10, %v854_v25  ;;  %1620 = vmatmul.mubr.msk.f32.vlgmr.msra.gmra.mrb[14].mxu0 %vm767_vm10, %v854_v25  ;;  %1623 = vmatpush3.msra.mxu1 %v109_v24 }
 0x26e   :  { %v855_v27 = vmul.f32 %v1671_v26, %v1995_v57  ;;  %1624 = vmatprep.mubr.msk.f32.mxu1 %vm1823_vm0, %v1822_v0 }
 0x270   :  { %1447 = vst.msk [vmem:[#allocation11 + $0x38] sm:$0xff] %vm767_vm10, %v855_v27  ;;  %1625 = vmatmul.mubr.msk.f32.vlgmr.msra.gmra.mrb[14].mxu1 %vm767_vm10, %v855_v27 }
 0x271   :  { %1771 = shalt.err (!%p1768_p8)
}
 0x272   :  { %s1772_s23 = scalar_lea.hbm %s2079_s5, 1024 }
 0x273   :  { %p1773_p9 = scmp.ne.s32.totalorder %s2079_s5, %s1772_s23  ;;  %p1776_p10 = scmp.lt.u32.totalorder %s1772_s23, %s2079_s5 }
 0x275   :  { %p1778_p11 = pnand %p1776_p10, %p1773_p9 }
 0x277   :  { %1781 = shalt.err (!%p1778_p11)
}
 0x278   :  { %1479 = dma.vmem_to_hbm [thread:$0]  %s1474_s18, 1024, %s2079_s5, [#allocation12], %s1816_s30, %s1816_s30, %s1817_s6  }
 0x279   :  { %s1826_s5 = smov [#allocation10]  }
 0x27a   :  { %s1461_s0 = sshll.u32 %s1826_s5, 4  ;;  %s1462_s0 = int_to_ptr.vmem [resolvable:$true] %s1461_s0 }
 0x27b   :  { %s1782_s21 = scalar_lea.vmem %s1462_s0, 1024  ;;  %p1787_p13 = scmp.lt.s32.totalorder %s1462_s0, %s1462_s0 }
 0x27c   :  { %p1783_p12 = scmp.ne.s32.totalorder %s1462_s0, %s1782_s21  ;;  %p1788_p0 = scmp.lt.s32.totalorder %s1782_s21, %s1782_s21 }
 0x27e   :  { %p1789_p1 = por %p1788_p0, %p1787_p13 }
 0x280   :  { %p1790_p2 = pnand %p1789_p1, %p1783_p12 }
 0x333   :  { %v925_v0 = vpop.f32.mrb[8].mxu0 }
 0x334   :  { %1448 = vst.msk [vmem:[#allocation10] sm:$0xff] %vm110_vm1, %v925_v0  ;;  %v1591_v28 = vpop.f32.mrb[9].mxu0 }
 0x337   :  { %v998_v29 = vpop.f32.mrb[8].mxu1 }
 0x338   :  { %1449 = vst.msk [vmem:[#allocation10 + $0x8] sm:$0xff] %vm110_vm1, %v998_v29  ;;  %v1071_v30 = vpop.f32.mrb[10].mxu0  ;;  %v1596_v31 = vpop.f32.mrb[9].mxu1 }
 0x339   :  { %1450 = vst.msk [vmem:[#allocation10 + $0x10] sm:$0xff] %vm110_vm1, %v1071_v30  ;;  %v1601_v32 = vpop.f32.mrb[11].mxu0 }
 0x33b   :  { %v1144_v33 = vpop.f32.mrb[10].mxu1 }
 0x33c   :  { %1451 = vst.msk [vmem:[#allocation10 + $0x18] sm:$0xff] %vm110_vm1, %v1144_v33  ;;  %v1217_v34 = vpop.f32.mrb[12].mxu0  ;;  %v1606_v35 = vpop.f32.mrb[11].mxu1 }
 0x33d   :  { %1452 = vst.msk [vmem:[#allocation10 + $0x20] sm:$0xff] %vm110_vm1, %v1217_v34  ;;  %v1611_v36 = vpop.f32.mrb[13].mxu0 }
 0x33f   :  { %v1290_v37 = vpop.f32.mrb[12].mxu1 }
 0x340   :  { %1453 = vst.msk [vmem:[#allocation10 + $0x28] sm:$0xff] %vm110_vm1, %v1290_v37  ;;  %v1363_v38 = vpop.f32.mrb[14].mxu0  ;;  %v1616_v39 = vpop.f32.mrb[13].mxu1 }
 0x341   :  { %1454 = vst.msk [vmem:[#allocation10 + $0x30] sm:$0xff] %vm110_vm1, %v1363_v38  ;;  %v1621_v40 = vpop.f32.mrb[15].mxu0 }
 0x343   :  { %v1436_v41 = vpop.f32.mrb[14].mxu1 }
 0x344   :  { %1455 = vst.msk [vmem:[#allocation10 + $0x38] sm:$0xff] %vm110_vm1, %v1436_v41  ;;  %v1626_v42 = vpop.f32.mrb[15].mxu1 }
 0x345   :  { %1793 = shalt.err (!%p1790_p2)
}
 0x346   :  { %s1794_s9 = scalar_lea.hbm %s2078_s4, 1024 }
 0x347   :  { %p1795_p3 = scmp.ne.s32.totalorder %s2078_s4, %s1794_s9  ;;  %p1798_p4 = scmp.lt.u32.totalorder %s1794_s9, %s2078_s4 }
 0x349   :  { %p1800_p5 = pnand %p1798_p4, %p1795_p3 }
 0x34b   :  { %1803 = shalt.err (!%p1800_p5)
}
 0x34c   :  { %1467 = dma.vmem_to_hbm [thread:$0]  %s1462_s0, 1024, %s2078_s4, [#allocation4], %s1816_s30, %s1816_s30, %s1817_s6  }
 0x34d   :  { %1810 = dma.done.wait [#allocation4], 1024  }
 0x34e   :  { %1811 = vsyncadd [#allocation4], 4294966272 }
 0x34f   :  { %1812 = dma.done.wait [#allocation12], 1024  }
 0x350   :  { %1813 = vsyncadd [#allocation12], 4294966272 }
 0x351   :  { %1486 = vsyncpa [#allocation3], 1 }
 0x352   :  { %1487 = vsyncpa [#allocation6], 1 }
 0x353   :  { %1488 = vsyncpa [#allocation9], 1 }
 0x354   :  { %1489 = vsyncpa [#allocation4], 1 }
 0x355   :  { %1490 = vsyncpa [#allocation12], 1 }

</bundles_post_ra>
